<compile_context>
chip_gen: v7x
topology: tpu7x:2x2x1
jax: 0.10.0
libtpu: 0.0.40
codegen_flags: <defaults>
</compile_context>

<pallas_src>
import jax
import jax.numpy as jnp
from jax.experimental import pallas as pl
from jax.experimental.pallas import tpu as pltpu


# ----------------------------------------------------------------------------
# Kernels
# ----------------------------------------------------------------------------
def _touch_kernel(x_ref, o_ref):
    # Output aliases the input HBM buffer: nothing to read or move.  The touch
    # is a fake read+write dep so the (side-effecting) kernel isn't elided.
    del x_ref
    pltpu.touch(o_ref)


def _copy_kernel(x_ref, o_ref):
    # Pure lane-dense tile copy (fallback materialized identity).
    o_ref[...] = x_ref[...]


# ----------------------------------------------------------------------------
# Wrappers
# ----------------------------------------------------------------------------
def _identity_alias(x):
    """Zero-copy identity: output aliases the input buffer, no DMAs issued."""
    return pl.pallas_call(
        _touch_kernel,
        out_shape=jax.ShapeDtypeStruct(x.shape, x.dtype),
        in_specs=[pl.BlockSpec(memory_space=pl.ANY)],
        out_specs=pl.BlockSpec(memory_space=pl.ANY),
        input_output_aliases={0: 0},
        compiler_params=pltpu.CompilerParams(has_side_effects=True),
    )(x)


def _round_up(n, m):
    return ((n + m - 1) // m) * m


def _identity_copy(x):
    """Materialized identity copy at ~HBM roofline (fallback path)."""
    orig_shape = x.shape
    total = x.size
    if total == 0:
        return x

    flat = x.reshape(total)
    padded = _round_up(total, 128)
    if padded != total:
        # Pad to a 128-multiple so the lane-dense tiled path always applies
        # (never a single whole-array VMEM block).
        flat = jnp.pad(flat, (0, padded - total))

    # Widest power-of-two lane axis that divides the element count: every
    # store is a full-width unmasked vst and row bookkeeping is minimal.
    lanes = 8192
    while lanes > 128 and padded % lanes != 0:
        lanes //= 2
    rows = padded // lanes

    # ~2 MiB blocks: double-buffered input + output ~= 8 MiB, comfortably
    # inside even v5e's 16 MiB scoped-VMEM default.
    itemsize = jnp.dtype(x.dtype).itemsize
    block_rows = max(8, ((2 << 20) // (lanes * itemsize)) // 8 * 8)
    block_rows = min(block_rows, rows)
    # v7x has 2 TensorCores: give mid-size copies at least 2 grid steps so the
    # "parallel" axis actually shards across both cores.
    if rows >= 16 and pl.cdiv(rows, block_rows) < 2:
        block_rows = _round_up(pl.cdiv(rows, 2), 8)

    grid = (pl.cdiv(rows, block_rows),)
    y2d = pl.pallas_call(
        _copy_kernel,
        out_shape=jax.ShapeDtypeStruct((rows, lanes), x.dtype),
        grid_spec=pltpu.PrefetchScalarGridSpec(
            num_scalar_prefetch=0,
            grid=grid,
            in_specs=[pl.BlockSpec((block_rows, lanes), lambda r: (r, 0))],
            out_specs=pl.BlockSpec((block_rows, lanes), lambda r: (r, 0)),
        ),
        compiler_params=pltpu.CompilerParams(
            dimension_semantics=("parallel",),
        ),
    )(flat.reshape(rows, lanes))

    out = y2d.reshape(padded)
    if padded != total:
        out = out[:total]
    return out.reshape(orig_shape)


def odenet_forward(x, t):
    """Pallas implementation of ODENet.forward(x, t) -> x.  `t` is unused."""
    del t  # Never read by the reference forward; not shipped to any kernel.
    try:
        return _identity_alias(x)
    except Exception:
        # If the aliased no-op cannot be lowered on this backend/JAX version,
        # fall back to the roofline-tuned materialized copy (still correct).
        return _identity_copy(x)


# ----------------------------------------------------------------------------
# Self-test
# ----------------------------------------------------------------------------
if __name__ == "__main__":
    key = jax.random.PRNGKey(0)
    kx, kt = jax.random.split(key)
    # Small NCHW shapes consistent with the module: B=2, C=4, 16x16 spatial.
    x = jax.random.normal(kx, (2, 4, 16, 16), dtype=jnp.float32)
    t = jax.random.uniform(kt, (), dtype=jnp.float32)

    # Eager call: authoritative correctness check.
    y = jax.block_until_ready(odenet_forward(x, t))
    assert y.shape == x.shape and y.dtype == x.dtype
    assert bool(jnp.allclose(y, x)), "identity forward mismatch"

    # Intended deployment pattern: jit + donate x so the aliased output reuses
    # x's buffer with no defensive copy.  Guarded so the eager check above
    # remains the gate even if donation/aliasing is unavailable here.
    try:
        jit_fwd = jax.jit(odenet_forward, donate_argnums=(0,))
        y2 = jax.block_until_ready(jit_fwd(jnp.array(x), t))
        donated_ok = bool(jnp.allclose(y2, x))
    except Exception:
        donated_ok = True
    assert donated_ok, "donated identity forward mismatch"

    print("KERNEL_OK")
</pallas_src>

<mosaic_0001>
module attributes {stable_mosaic.version = 11 : i64} {
  func.func @_touch_kernel(%arg0: memref<2x4x16x16xf32, #tpu.memory_space<any>>, %arg1: memref<2x4x16x16xf32, #tpu.memory_space<any>>) attributes {dimension_semantics = [], scalar_prefetch = 0 : i64, scratch_operands = 0 : i64, tpu.core_type = #tpu.core_type<tc>} {
    return
  }
}

module attributes {stable_mosaic.version = 11 : i64} {
  func.func @_copy_kernel(%arg0: i32, %arg1: memref<1x2048xf32, #tpu.memory_space<vmem>>, %arg2: memref<1x2048xf32, #tpu.memory_space<vmem>>) attributes {dimension_semantics = [#tpu.dimension_semantics<parallel>], iteration_bounds = array<i64: 1>, scalar_prefetch = 0 : i64, scratch_operands = 0 : i64, tpu.core_type = #tpu.core_type<tc>, window_params = [{transform_indices = @transform_0, window_bounds = array<i64: 1, 2048>}, {transform_indices = @transform_1, window_bounds = array<i64: 1, 2048>}]} {
    %c0 = arith.constant 0 : index
    %c0_0 = arith.constant 0 : index
    %0 = vector.load %arg1[%c0, %c0_0] : memref<1x2048xf32, #tpu.memory_space<vmem>>, vector<1x2048xf32>
    %c0_1 = arith.constant 0 : index
    %c0_2 = arith.constant 0 : index
    %1 = vector.load %arg2[%c0_1, %c0_2] : memref<1x2048xf32, #tpu.memory_space<vmem>>, vector<1x2048xf32>
    tpu.vector_store %arg2[%c0_1, %c0_2], %0 {strides = array<i32>} : memref<1x2048xf32, #tpu.memory_space<vmem>>, vector<1x2048xf32>,
    return
  }
  func.func @transform_0(%arg0: i32) -> (i32, i32) {
    %c0_i32 = arith.constant 0 : i32
    %c0_i32_0 = arith.constant 0 : i32
    return %arg0, %c0_i32 : i32, i32
  }
  func.func @transform_1(%arg0: i32) -> (i32, i32) {
    %c0_i32 = arith.constant 0 : i32
    %c0_i32_0 = arith.constant 0 : i32
    return %arg0, %c0_i32 : i32, i32
  }
}

</mosaic_0001>

<bundles_post_ra>
// kernel: tpu_custom_call.1
= control target key start
LH: loop header
LB: loop body
LE: loop exit
PB: predicated region body
PF: predicated region fallthrough
CT: control target
= control target key end

     0   :  { %s16_s0 = inlined_call_operand.hbm [shape: f32[2,4,16,16], index: 0, kind: input, shape index: {}, may-alias: {0,1}]   ;;  %s17_s1 = inlined_call_operand.hbm [shape: f32[2,4,16,16], index: 1, kind: output, shape index: {}, may-alias: {0,1}]  }

// kernel: tpu_custom_call.1
= control target key start
LH: loop header
LB: loop body
LE: loop exit
PB: predicated region body
PF: predicated region fallthrough
CT: control target
= control target key end

     0   :  { %6 = vsyncpa [#allocation3], 0  ;;  %s126_s0 = inlined_call_operand.hbm [shape: f32[1,2048], index: 0, kind: input, shape index: {}]   ;;  %s127_s1 = inlined_call_operand.hbm [shape: f32[1,2048], index: 1, kind: output, shape index: {}]  }
   0x1   :  { %7 = vsyncpa [#allocation4], 0  ;;  %s90_s6 = smov [#allocation2]   ;;  %s42_s10 = scalar_lea.hbm %s126_s0, 256 }
   0x2   :  { %s14_s7 = sshll.u32 %s90_s6, 4  ;;  %p43_p0 = scmp.ne.s32.totalorder %s126_s0, %s42_s10  ;;  %s15_s7 = int_to_ptr.vmem [resolvable:$true] %s14_s7 }
   0x3   :  { %p46_p1 = scmp.lt.u32.totalorder %s42_s10, %s126_s0 }
   0x5   :  { %p48_p2 = pnand %p46_p1, %p43_p0 }
   0x7   :  { %51 = shalt.err (!%p48_p2)
}
   0x8   :  { %s52_s15 = scalar_lea.vmem %s15_s7, 256  ;;  %p57_p4 = scmp.lt.s32.totalorder %s15_s7, %s15_s7 }
   0x9   :  { %p53_p3 = scmp.ne.s32.totalorder %s15_s7, %s52_s15  ;;  %p58_p5 = scmp.lt.s32.totalorder %s52_s15, %s52_s15 }
   0xb   :  { %p59_p6 = por %p58_p5, %p57_p4 }
   0xd   :  { %p60_p7 = pnand %p59_p6, %p53_p3 }
   0xf   :  { %63 = shalt.err (!%p60_p7)
}
  0x10   :  { %17 = dma.hbm_to_vmem [thread:$0]  %s126_s0, 256, %s15_s7, [#allocation3]  }
  0x11   :  { %86 = dma.done.wait [#allocation3], 256  }
  0x12   :  { %87 = vsyncadd [#allocation3], 4294967040  ;;  %s91_s18 = smov [#allocation5]   ;;  %v21_v0 = vld [vmem:[#allocation2] sm:$0xff]  ;;  %v22_v1 = vld [vmem:[#allocation2 + $0x8] sm:$0xff] }
  0x13   :  { %s31_s19 = sshll.u32 %s91_s18, 4  ;;  %23 = vst [vmem:[#allocation5] sm:$0xff] %v21_v0  ;;  %24 = vst [vmem:[#allocation5 + $0x8] sm:$0xff] %v22_v1  ;;  %s32_s19 = int_to_ptr.vmem [resolvable:$true] %s31_s19 }
  0x14   :  { %s64_s20 = scalar_lea.vmem %s32_s19, 256  ;;  %p69_p9 = scmp.lt.s32.totalorder %s32_s19, %s32_s19 }
  0x15   :  { %p65_p8 = scmp.ne.s32.totalorder %s32_s19, %s64_s20  ;;  %p70_p10 = scmp.lt.s32.totalorder %s64_s20, %s64_s20 }
  0x17   :  { %p71_p11 = por %p70_p10, %p69_p9 }
  0x19   :  { %p72_p12 = pnand %p71_p11, %p65_p8 }
  0x1b   :  { %75 = shalt.err (!%p72_p12)
}
  0x1c   :  { %s76_s0 = scalar_lea.hbm %s127_s1, 256 }
  0x1d   :  { %p77_p13 = scmp.ne.s32.totalorder %s127_s1, %s76_s0  ;;  %p80_p0 = scmp.lt.u32.totalorder %s76_s0, %s127_s1 }
  0x1f   :  { %p82_p1 = pnand %p80_p0, %p77_p13 }
  0x21   :  { %85 = shalt.err (!%p82_p1)
}
  0x22   :  { %34 = dma.vmem_to_hbm [thread:$0]  %s32_s19, 256, %s127_s1, [#allocation4]  }
  0x23   :  { %88 = dma.done.wait [#allocation4], 256  }
  0x24   :  { %89 = vsyncadd [#allocation4], 4294967040 }
  0x25   :  { %38 = vsyncpa [#allocation3], 1 }
  0x26   :  { %39 = vsyncpa [#allocation4], 1 }

</bundles_post_ra>
